<compile_context>
chip_gen: v7x
topology: tpu7x:2x2x1
jax: 0.10.0
libtpu: 0.0.40
codegen_flags: <defaults>
</compile_context>

<pallas_src>
from functools import partial

import numpy as np

import jax
import jax.numpy as jnp
from jax.experimental import pallas as pl
from jax.experimental.pallas import tpu as pltpu


# ---------------------------------------------------------------------------
# Kernel
# ---------------------------------------------------------------------------
def _resize_kernel(x_ref, wy_ref, wxt_ref, o_ref, *, row_first):
    """One grid step: B full-resolution planes -> B resized (T, T) planes.

    x_ref:   (B, H, W)  planes in their original dtype (crop NOT pre-applied)
    wy_ref:  (T, H)     bf16 row-interp weights, crop window folded in
    wxt_ref: (W, T)     bf16 col-interp weights, pre-transposed on the host
    o_ref:   (B, T, T)
    row_first: static; contract H first (True) or W first (False)
    """
    wy = wy_ref[...]        # bf16, VMEM-resident
    wxt = wxt_ref[...]      # bf16, VMEM-resident
    b = x_ref.shape[0]
    out_is_int = jnp.issubdtype(o_ref.dtype, jnp.integer)
    for i in range(b):      # static unroll; B is small
        xb = x_ref[i].astype(jnp.bfloat16)                                 # (H, W)
        if row_first:       # reduce H first (cheaper when H >= W)
            tmp = jnp.dot(wy, xb, preferred_element_type=jnp.float32)      # (T, W)
            out = jnp.dot(tmp.astype(jnp.bfloat16), wxt,
                          preferred_element_type=jnp.float32)              # (T, T)
        else:               # reduce W first (cheaper when W > H)
            tmp = jnp.dot(xb, wxt, preferred_element_type=jnp.float32)     # (H, T)
            out = jnp.dot(wy, tmp.astype(jnp.bfloat16),
                          preferred_element_type=jnp.float32)              # (T, T)
        if out_is_int:
            info = jnp.iinfo(o_ref.dtype)
            out = jnp.clip(jnp.round(out), info.min, info.max)  # torch int semantics
        o_ref[i] = out.astype(o_ref.dtype)


# ---------------------------------------------------------------------------
# Host helpers
# ---------------------------------------------------------------------------
def _bilinear_crop_matrix(out_size: int, crop_size: int, full_size: int,
                          offset: int) -> np.ndarray:
    """Separable bilinear weights (align_corners=False, antialias=False) that
    simultaneously crop a `crop_size`-wide window starting at `offset` out of a
    `full_size` axis and resize it to `out_size`."""
    scale = crop_size / out_size
    dst = np.arange(out_size, dtype=np.float64)
    src = (dst + 0.5) * scale - 0.5
    src = np.clip(src, 0.0, crop_size - 1)
    i0 = np.floor(src).astype(np.int64)
    i1 = np.minimum(i0 + 1, crop_size - 1)
    lam = src - i0
    w = np.zeros((out_size, full_size), np.float32)
    rows = np.arange(out_size)
    np.add.at(w, (rows, offset + i0), (1.0 - lam).astype(np.float32))
    np.add.at(w, (rows, offset + i1), lam.astype(np.float32))
    return w


def _largest_divisor_leq(n: int, cap: int) -> int:
    cap = max(1, min(n, cap))
    for d in range(cap, 0, -1):
        if n % d == 0:
            return d
    return 1


def _draw_params(h: int, w: int, size: int, seed: int):
    """Host-side scalar randomness, mirroring the torch module's .item() calls."""
    s_min = min(w, h)
    rng = np.random.default_rng(seed)
    lo_h = 3 * (h - s_min) // 8
    hi_h = max(lo_h + 1, 5 * (h - s_min) // 8)
    off_h = int(rng.integers(lo_h, hi_h))
    lo_w = 3 * (w - s_min) // 8
    hi_w = max(lo_w + 1, 5 * (w - s_min) // 8)
    off_w = int(rng.integers(lo_w, hi_w))
    t_max = max(min(s_min, round(9 / 8 * size)), size)
    t = int(rng.integers(size, t_max + 1))
    return off_h, off_w, s_min, t


# ---------------------------------------------------------------------------
# Pallas wrapper
# ---------------------------------------------------------------------------
def pallas_crop_resize(planes, wy_bf16, wxt_bf16, out_dtype, row_first):
    nc, h, w = planes.shape
    t = wy_bf16.shape[0]

    # Size the per-step plane batch so double-buffered in+out blocks plus the
    # resident weights stay under a 16 MiB block budget (vmem_limit raised to
    # 32 MiB, valid across v5e/v6e/v7x).
    in_bytes = h * w * planes.dtype.itemsize
    out_bytes = t * t * jnp.dtype(out_dtype).itemsize
    weight_bytes = 2 * (t * h + w * t) * 2          # both matrices, double-buffered
    budget = 16 * 1024 * 1024
    usable = max(budget - weight_bytes, in_bytes + out_bytes)
    cap = max(1, usable // (2 * (in_bytes + out_bytes)))
    b = _largest_divisor_leq(nc, min(cap, 32))
    grid = (nc // b,)

    flops_per_plane = (2 * t * h * w + 2 * t * t * w) if row_first \
        else (2 * h * w * t + 2 * t * t * h)
    cost = pl.CostEstimate(
        flops=nc * flops_per_plane,
        transcendentals=0,
        bytes_accessed=nc * (in_bytes + out_bytes) + weight_bytes // 2)

    return pl.pallas_call(
        partial(_resize_kernel, row_first=row_first),
        out_shape=jax.ShapeDtypeStruct((nc, t, t), out_dtype),
        grid_spec=pltpu.PrefetchScalarGridSpec(
            num_scalar_prefetch=0,
            grid=grid,
            in_specs=[
                pl.BlockSpec((b, h, w), lambda i: (i, 0, 0)),  # B planes / step
                pl.BlockSpec((t, h), lambda i: (0, 0)),        # Wy   (resident)
                pl.BlockSpec((w, t), lambda i: (0, 0)),        # Wx^T (resident)
            ],
            out_specs=pl.BlockSpec((b, t, t), lambda i: (i, 0, 0)),
        ),
        compiler_params=pltpu.CompilerParams(
            dimension_semantics=("parallel",),      # plane axis is independent
            vmem_limit_bytes=32 * 1024 * 1024),
        cost_estimate=cost,
    )(planes, wy_bf16, wxt_bf16)


def augmentation_dalle(img, size, seed=0):
    """JAX/Pallas port of AugmentationDALLE.forward.

    img: (N, C, H, W). Random s_min x s_min crop (offset ~ U over [3/8, 5/8] of
    the slack), then bilinear resize to t x t with t ~ U[size, t_max].
    """
    n, c, h, w = img.shape
    off_h, off_w, s_min, t = _draw_params(h, w, size, seed)

    # TODO(synk): implements antialias=False (classic bilinear) semantics;
    # newer torchvision defaults to antialias=True for tensor inputs.
    wy = _bilinear_crop_matrix(t, s_min, h, off_h)                 # (T, H)
    wxt = np.ascontiguousarray(
        _bilinear_crop_matrix(t, s_min, w, off_w).T)               # (W, T)
    wy_bf16 = jnp.asarray(wy, dtype=jnp.bfloat16)
    wxt_bf16 = jnp.asarray(wxt, dtype=jnp.bfloat16)

    planes = img.reshape(n * c, h, w)   # contiguous reshape, no HBM copy
    out = pallas_crop_resize(planes, wy_bf16, wxt_bf16, img.dtype,
                             row_first=(h >= w))
    return out.reshape(n, c, t, t)


# ---------------------------------------------------------------------------
# Demo / self-test
# ---------------------------------------------------------------------------
if __name__ == "__main__":
    key = jax.random.PRNGKey(0)
    N, C, H, W = 2, 3, 20, 16   # non-square so the crop is non-trivial
    size = 8                    # AugmentationDALLE(size=8)
    seed = 0

    img = jax.random.uniform(key, (N, C, H, W), dtype=jnp.float32)
    out = augmentation_dalle(img, size, seed=seed)
    out = jax.block_until_ready(out)

    t_max = max(min(min(H, W), round(9 / 8 * size)), size)
    assert out.ndim == 4 and out.shape[:2] == (N, C)
    assert size <= out.shape[2] <= t_max
    assert out.shape[2] == out.shape[3]

    # Full-precision reference (crop folded into f32 weight matrices) to
    # validate the bf16 kernel math.
    off_h, off_w, s_min, t = _draw_params(H, W, size, seed)
    wy_ref = jnp.asarray(_bilinear_crop_matrix(t, s_min, H, off_h))
    wx_ref = jnp.asarray(_bilinear_crop_matrix(t, s_min, W, off_w))
    ref = jnp.einsum("yh,nchw,xw->ncyx", wy_ref, img, wx_ref)
    np.testing.assert_allclose(np.asarray(out), np.asarray(ref),
                               rtol=5e-2, atol=5e-2)

    print("KERNEL_OK")
</pallas_src>

<mosaic_0001>
module attributes {stable_mosaic.version = 11 : i64} {
  func.func @_resize_kernel(%arg0: i32, %arg1: memref<6x20x16xf32, #tpu.memory_space<vmem>>, %arg2: memref<9x20xbf16, #tpu.memory_space<vmem>>, %arg3: memref<16x9xbf16, #tpu.memory_space<vmem>>, %arg4: memref<6x9x9xf32, #tpu.memory_space<vmem>>) attributes {dimension_semantics = [#tpu.dimension_semantics<parallel>], iteration_bounds = array<i64: 1>, scalar_prefetch = 0 : i64, scratch_operands = 0 : i64, tpu.core_type = #tpu.core_type<tc>, window_params = [{transform_indices = @transform_0, window_bounds = array<i64: 6, 20, 16>}, {pipeline_mode = #tpu.pipeline_mode<synchronous>, transform_indices = @transform_1, window_bounds = array<i64: 9, 20>}, {pipeline_mode = #tpu.pipeline_mode<synchronous>, transform_indices = @transform_2, window_bounds = array<i64: 16, 9>}, {transform_indices = @transform_3, window_bounds = array<i64: 6, 9, 9>}]} {
    %c0 = arith.constant 0 : index
    %c0_0 = arith.constant 0 : index
    %0 = vector.load %arg2[%c0, %c0_0] : memref<9x20xbf16, #tpu.memory_space<vmem>>, vector<9x20xbf16>
    %c0_1 = arith.constant 0 : index
    %c0_2 = arith.constant 0 : index
    %1 = vector.load %arg3[%c0_1, %c0_2] : memref<16x9xbf16, #tpu.memory_space<vmem>>, vector<16x9xbf16>
    %c0_3 = arith.constant 0 : index
    %c0_4 = arith.constant 0 : index
    %c0_5 = arith.constant 0 : index
    %2 = vector.load %arg1[%c0_3, %c0_4, %c0_5] : memref<6x20x16xf32, #tpu.memory_space<vmem>>, vector<1x20x16xf32>
    %3 = vector.shape_cast %2 : vector<1x20x16xf32> to vector<20x16xf32>
    %4 = arith.truncf %3 : vector<20x16xf32> to vector<20x16xbf16>
    %cst = arith.constant dense<0.000000e+00> : vector<9x16xf32>
    %5 = tpu.matmul %0, %4, %cst {dimension_numbers = #tpu.dot_dimension_numbers<[1], [0], [0], [1], [0, 0, 1, 1], [], []>} : vector<9x20xbf16>, vector<20x16xbf16>, vector<9x16xf32> -> vector<9x16xf32>
    %6 = arith.truncf %5 : vector<9x16xf32> to vector<9x16xbf16>
    %cst_6 = arith.constant dense<0.000000e+00> : vector<9x9xf32>
    %7 = tpu.matmul %6, %1, %cst_6 {dimension_numbers = #tpu.dot_dimension_numbers<[1], [0], [0], [1], [0, 0, 1, 1], [], []>} : vector<9x16xbf16>, vector<16x9xbf16>, vector<9x9xf32> -> vector<9x9xf32>
    %c0_7 = arith.constant 0 : index
    %c0_8 = arith.constant 0 : index
    %c0_9 = arith.constant 0 : index
    %8 = vector.load %arg4[%c0_7, %c0_8, %c0_9] : memref<6x9x9xf32, #tpu.memory_space<vmem>>, vector<1x9x9xf32>
    %9 = vector.shape_cast %8 : vector<1x9x9xf32> to vector<9x9xf32>
    %10 = vector.shape_cast %7 : vector<9x9xf32> to vector<1x9x9xf32>
    tpu.vector_store %arg4[%c0_7, %c0_8, %c0_9], %10 {strides = array<i32>} : memref<6x9x9xf32, #tpu.memory_space<vmem>>, vector<1x9x9xf32>,
    %c1 = arith.constant 1 : index
    %c0_10 = arith.constant 0 : index
    %c0_11 = arith.constant 0 : index
    %11 = vector.load %arg1[%c1, %c0_10, %c0_11] : memref<6x20x16xf32, #tpu.memory_space<vmem>>, vector<1x20x16xf32>
    %12 = vector.shape_cast %11 : vector<1x20x16xf32> to vector<20x16xf32>
    %13 = arith.truncf %12 : vector<20x16xf32> to vector<20x16xbf16>
    %cst_12 = arith.constant dense<0.000000e+00> : vector<9x16xf32>
    %14 = tpu.matmul %0, %13, %cst_12 {dimension_numbers = #tpu.dot_dimension_numbers<[1], [0], [0], [1], [0, 0, 1, 1], [], []>} : vector<9x20xbf16>, vector<20x16xbf16>, vector<9x16xf32> -> vector<9x16xf32>
    %15 = arith.truncf %14 : vector<9x16xf32> to vector<9x16xbf16>
    %cst_13 = arith.constant dense<0.000000e+00> : vector<9x9xf32>
    %16 = tpu.matmul %15, %1, %cst_13 {dimension_numbers = #tpu.dot_dimension_numbers<[1], [0], [0], [1], [0, 0, 1, 1], [], []>} : vector<9x16xbf16>, vector<16x9xbf16>, vector<9x9xf32> -> vector<9x9xf32>
    %c1_14 = arith.constant 1 : index
    %c0_15 = arith.constant 0 : index
    %c0_16 = arith.constant 0 : index
    %17 = vector.load %arg4[%c1_14, %c0_15, %c0_16] : memref<6x9x9xf32, #tpu.memory_space<vmem>>, vector<1x9x9xf32>
    %18 = vector.shape_cast %17 : vector<1x9x9xf32> to vector<9x9xf32>
    %19 = vector.shape_cast %16 : vector<9x9xf32> to vector<1x9x9xf32>
    tpu.vector_store %arg4[%c1_14, %c0_15, %c0_16], %19 {strides = array<i32>} : memref<6x9x9xf32, #tpu.memory_space<vmem>>, vector<1x9x9xf32>,
    %c2 = arith.constant 2 : index
    %c0_17 = arith.constant 0 : index
    %c0_18 = arith.constant 0 : index
    %20 = vector.load %arg1[%c2, %c0_17, %c0_18] : memref<6x20x16xf32, #tpu.memory_space<vmem>>, vector<1x20x16xf32>
    %21 = vector.shape_cast %20 : vector<1x20x16xf32> to vector<20x16xf32>
    %22 = arith.truncf %21 : vector<20x16xf32> to vector<20x16xbf16>
    %cst_19 = arith.constant dense<0.000000e+00> : vector<9x16xf32>
    %23 = tpu.matmul %0, %22, %cst_19 {dimension_numbers = #tpu.dot_dimension_numbers<[1], [0], [0], [1], [0, 0, 1, 1], [], []>} : vector<9x20xbf16>, vector<20x16xbf16>, vector<9x16xf32> -> vector<9x16xf32>
    %24 = arith.truncf %23 : vector<9x16xf32> to vector<9x16xbf16>
    %cst_20 = arith.constant dense<0.000000e+00> : vector<9x9xf32>
    %25 = tpu.matmul %24, %1, %cst_20 {dimension_numbers = #tpu.dot_dimension_numbers<[1], [0], [0], [1], [0, 0, 1, 1], [], []>} : vector<9x16xbf16>, vector<16x9xbf16>, vector<9x9xf32> -> vector<9x9xf32>
    %c2_21 = arith.constant 2 : index
    %c0_22 = arith.constant 0 : index
    %c0_23 = arith.constant 0 : index
    %26 = vector.load %arg4[%c2_21, %c0_22, %c0_23] : memref<6x9x9xf32, #tpu.memory_space<vmem>>, vector<1x9x9xf32>
    %27 = vector.shape_cast %26 : vector<1x9x9xf32> to vector<9x9xf32>
    %28 = vector.shape_cast %25 : vector<9x9xf32> to vector<1x9x9xf32>
    tpu.vector_store %arg4[%c2_21, %c0_22, %c0_23], %28 {strides = array<i32>} : memref<6x9x9xf32, #tpu.memory_space<vmem>>, vector<1x9x9xf32>,
    %c3 = arith.constant 3 : index
    %c0_24 = arith.constant 0 : index
    %c0_25 = arith.constant 0 : index
    %29 = vector.load %arg1[%c3, %c0_24, %c0_25] : memref<6x20x16xf32, #tpu.memory_space<vmem>>, vector<1x20x16xf32>
    %30 = vector.shape_cast %29 : vector<1x20x16xf32> to vector<20x16xf32>
    %31 = arith.truncf %30 : vector<20x16xf32> to vector<20x16xbf16>
    %cst_26 = arith.constant dense<0.000000e+00> : vector<9x16xf32>
    %32 = tpu.matmul %0, %31, %cst_26 {dimension_numbers = #tpu.dot_dimension_numbers<[1], [0], [0], [1], [0, 0, 1, 1], [], []>} : vector<9x20xbf16>, vector<20x16xbf16>, vector<9x16xf32> -> vector<9x16xf32>
    %33 = arith.truncf %32 : vector<9x16xf32> to vector<9x16xbf16>
    %cst_27 = arith.constant dense<0.000000e+00> : vector<9x9xf32>
    %34 = tpu.matmul %33, %1, %cst_27 {dimension_numbers = #tpu.dot_dimension_numbers<[1], [0], [0], [1], [0, 0, 1, 1], [], []>} : vector<9x16xbf16>, vector<16x9xbf16>, vector<9x9xf32> -> vector<9x9xf32>
    %c3_28 = arith.constant 3 : index
    %c0_29 = arith.constant 0 : index
    %c0_30 = arith.constant 0 : index
    %35 = vector.load %arg4[%c3_28, %c0_29, %c0_30] : memref<6x9x9xf32, #tpu.memory_space<vmem>>, vector<1x9x9xf32>
    %36 = vector.shape_cast %35 : vector<1x9x9xf32> to vector<9x9xf32>
    %37 = vector.shape_cast %34 : vector<9x9xf32> to vector<1x9x9xf32>
    tpu.vector_store %arg4[%c3_28, %c0_29, %c0_30], %37 {strides = array<i32>} : memref<6x9x9xf32, #tpu.memory_space<vmem>>, vector<1x9x9xf32>,
    %c4 = arith.constant 4 : index
    %c0_31 = arith.constant 0 : index
    %c0_32 = arith.constant 0 : index
    %38 = vector.load %arg1[%c4, %c0_31, %c0_32] : memref<6x20x16xf32, #tpu.memory_space<vmem>>, vector<1x20x16xf32>
    %39 = vector.shape_cast %38 : vector<1x20x16xf32> to vector<20x16xf32>
    %40 = arith.truncf %39 : vector<20x16xf32> to vector<20x16xbf16>
    %cst_33 = arith.constant dense<0.000000e+00> : vector<9x16xf32>
    %41 = tpu.matmul %0, %40, %cst_33 {dimension_numbers = #tpu.dot_dimension_numbers<[1], [0], [0], [1], [0, 0, 1, 1], [], []>} : vector<9x20xbf16>, vector<20x16xbf16>, vector<9x16xf32> -> vector<9x16xf32>
    %42 = arith.truncf %41 : vector<9x16xf32> to vector<9x16xbf16>
    %cst_34 = arith.constant dense<0.000000e+00> : vector<9x9xf32>
    %43 = tpu.matmul %42, %1, %cst_34 {dimension_numbers = #tpu.dot_dimension_numbers<[1], [0], [0], [1], [0, 0, 1, 1], [], []>} : vector<9x16xbf16>, vector<16x9xbf16>, vector<9x9xf32> -> vector<9x9xf32>
    %c4_35 = arith.constant 4 : index
    %c0_36 = arith.constant 0 : index
    %c0_37 = arith.constant 0 : index
    %44 = vector.load %arg4[%c4_35, %c0_36, %c0_37] : memref<6x9x9xf32, #tpu.memory_space<vmem>>, vector<1x9x9xf32>
    %45 = vector.shape_cast %44 : vector<1x9x9xf32> to vector<9x9xf32>
    %46 = vector.shape_cast %43 : vector<9x9xf32> to vector<1x9x9xf32>
    tpu.vector_store %arg4[%c4_35, %c0_36, %c0_37], %46 {strides = array<i32>} : memref<6x9x9xf32, #tpu.memory_space<vmem>>, vector<1x9x9xf32>,
    %c5 = arith.constant 5 : index
    %c0_38 = arith.constant 0 : index
    %c0_39 = arith.constant 0 : index
    %47 = vector.load %arg1[%c5, %c0_38, %c0_39] : memref<6x20x16xf32, #tpu.memory_space<vmem>>, vector<1x20x16xf32>
    %48 = vector.shape_cast %47 : vector<1x20x16xf32> to vector<20x16xf32>
    %49 = arith.truncf %48 : vector<20x16xf32> to vector<20x16xbf16>
    %cst_40 = arith.constant dense<0.000000e+00> : vector<9x16xf32>
    %50 = tpu.matmul %0, %49, %cst_40 {dimension_numbers = #tpu.dot_dimension_numbers<[1], [0], [0], [1], [0, 0, 1, 1], [], []>} : vector<9x20xbf16>, vector<20x16xbf16>, vector<9x16xf32> -> vector<9x16xf32>
    %51 = arith.truncf %50 : vector<9x16xf32> to vector<9x16xbf16>
    %cst_41 = arith.constant dense<0.000000e+00> : vector<9x9xf32>
    %52 = tpu.matmul %51, %1, %cst_41 {dimension_numbers = #tpu.dot_dimension_numbers<[1], [0], [0], [1], [0, 0, 1, 1], [], []>} : vector<9x16xbf16>, vector<16x9xbf16>, vector<9x9xf32> -> vector<9x9xf32>
    %c5_42 = arith.constant 5 : index
    %c0_43 = arith.constant 0 : index
    %c0_44 = arith.constant 0 : index
    %53 = vector.load %arg4[%c5_42, %c0_43, %c0_44] : memref<6x9x9xf32, #tpu.memory_space<vmem>>, vector<1x9x9xf32>
    %54 = vector.shape_cast %53 : vector<1x9x9xf32> to vector<9x9xf32>
    %55 = vector.shape_cast %52 : vector<9x9xf32> to vector<1x9x9xf32>
    tpu.vector_store %arg4[%c5_42, %c0_43, %c0_44], %55 {strides = array<i32>} : memref<6x9x9xf32, #tpu.memory_space<vmem>>, vector<1x9x9xf32>,
    return
  }
  func.func @transform_0(%arg0: i32) -> (i32, i32, i32) {
    %c0_i32 = arith.constant 0 : i32
    %c0_i32_0 = arith.constant 0 : i32
    %c0_i32_1 = arith.constant 0 : i32
    return %arg0, %c0_i32, %c0_i32_0 : i32, i32, i32
  }
  func.func @transform_1(%arg0: i32) -> (i32, i32) {
    %c0_i32 = arith.constant 0 : i32
    %c0_i32_0 = arith.constant 0 : i32
    %c0_i32_1 = arith.constant 0 : i32
    return %c0_i32, %c0_i32_0 : i32, i32
  }
  func.func @transform_2(%arg0: i32) -> (i32, i32) {
    %c0_i32 = arith.constant 0 : i32
    %c0_i32_0 = arith.constant 0 : i32
    %c0_i32_1 = arith.constant 0 : i32
    return %c0_i32, %c0_i32_0 : i32, i32
  }
  func.func @transform_3(%arg0: i32) -> (i32, i32, i32) {
    %c0_i32 = arith.constant 0 : i32
    %c0_i32_0 = arith.constant 0 : i32
    %c0_i32_1 = arith.constant 0 : i32
    return %arg0, %c0_i32, %c0_i32_0 : i32, i32, i32
  }
}

</mosaic_0001>

<bundles_post_ra>
// kernel: tpu_custom_call.1
= control target key start
LH: loop header
LB: loop body
LE: loop exit
PB: predicated region body
PF: predicated region fallthrough
CT: control target
= control target key end

     0   :  { %v785_v0 = vmov 0.0   ;;  %vm786_vm0 = vmmov 0   ;;  %vm33_vm1 = vcmask 1041408   ;;  %vm29_vm2 = vcmask 162816   ;;  %s991_s0 = inlined_call_operand.vmem [shape: f32[6,20,16], index: 0, kind: input, shape index: {}]   ;;  %s992_s1 = inlined_call_operand.vmem [shape: bf16[9,20], index: 1, kind: input, shape index: {}]   ;;  %s993_s2 = inlined_call_operand.vmem [shape: bf16[16,9], index: 2, kind: input, shape index: {}]   ;;  %s994_s3 = inlined_call_operand.vmem [shape: f32[6,9,9], index: 3, kind: output, shape index: {}]  }
   0x1   :  { %697 = vmatprep.subr.bf16.mxu0 %v785_v0  ;;  %v19_v1 = vld [vmem:[%s991_s0] sm:$0xff]  ;;  %v20_v2 = vld [vmem:[%s991_s0 + $0x8] sm:$0xff]  ;;  %v21_v3 = vld [vmem:[%s991_s0 + $0x10] sm:$0xf]  ;;  %701 = vmatprep.mubr.msk.bf16.mxu0 %vm786_vm0, %v785_v0  ;;  %vm85_vm3 = vcmask 130048   ;;  %vm130_vm4 = vcmask 72704  }
   0x2   :  { %v22_v4 = vpack.c.bf16 %v20_v2, %v19_v1  ;;  %v23_v5 = vpack.c.bf16 %v21_v3, %v21_v3  ;;  %705 = vmatprep.subr.bf16.mxu1 %v785_v0  ;;  %707 = vmatprep.mubr.msk.bf16.mxu1 %vm786_vm0, %v785_v0  ;;  %v827_v7 = vld [vmem:[%s992_s1] sm:$0x1f]   ;;  %v632_v9 = vld [vmem:[%s991_s0 + $0x18] sm:$0xff]  ;;  %v634_v12 = vld [vmem:[%s991_s0 + $0x28] sm:$0xf]  ;;  %vm132_vm5 = vcmask 65536  }
   0x3   :  { %v837_v8 = vld [vmem:[%s993_s2] sm:$0xff]   ;;  %v139_v18 = vpack.c.bf16 %v634_v12, %v634_v12  ;;  %v639_v20 = vld [vmem:[%s991_s0 + $0x30] sm:$0xff]  ;;  %v640_v21 = vld [vmem:[%s991_s0 + $0x38] sm:$0xff] }
   0x4   :  { %698 = vmatpush3.bf16.msra.mxu0 %v22_v4  ;;  %v35_v6 = vsel %vm33_vm1, %v23_v5, 0  ;;  %706 = vmatpush3.bf16.msra.mxu1 %v837_v8  ;;  %v633_v10 = vld [vmem:[%s991_s0 + $0x20] sm:$0xff]  ;;  %v236_v23 = vpack.c.bf16 %v640_v21, %v639_v20  ;;  %v646_v26 = vld [vmem:[%s991_s0 + $0x48] sm:$0xff]  ;;  %v647_v27 = vld [vmem:[%s991_s0 + $0x50] sm:$0xff] }
   0x5   :  { %699 = vmatprep.subr.bf16.mxu0 %v785_v0  ;;  %711 = vmatprep.subr.bf16.mxu1 %v785_v0  ;;  %v138_v15 = vpack.c.bf16 %v633_v10, %v632_v9  ;;  %v141_v19 = vsel %vm33_vm1, %v139_v18, 0  ;;  %v641_v22 = vld [vmem:[%s991_s0 + $0x40] sm:$0xf]  ;;  %v648_v28 = vld [vmem:[%s991_s0 + $0x58] sm:$0xf]  ;;  %v334_v29 = vpack.c.bf16 %v647_v27, %v646_v26  ;;  %v654_v33 = vld [vmem:[%s991_s0 + $0x68] sm:$0xff] }
   0x6   :  { %v237_v24 = vpack.c.bf16 %v641_v22, %v641_v22  ;;  %v335_v30 = vpack.c.bf16 %v648_v28, %v648_v28  ;;  %v653_v32 = vld [vmem:[%s991_s0 + $0x60] sm:$0xff]  ;;  %v655_v34 = vld [vmem:[%s991_s0 + $0x70] sm:$0xf]  ;;  %v660_v38 = vld [vmem:[%s991_s0 + $0x78] sm:$0xff] }
   0x7   :  { %v432_v35 = vpack.c.bf16 %v654_v33, %v653_v32  ;;  %v433_v36 = vpack.c.bf16 %v655_v34, %v655_v34  ;;  %v661_v39 = vld [vmem:[%s991_s0 + $0x80] sm:$0xff]  ;;  %v662_v40 = vld [vmem:[%s991_s0 + $0x88] sm:$0xf] }
   0x8   :  { %700 = vmatpush3.bf16.msra.mxu0 %v35_v6  ;;  %v239_v25 = vsel %vm33_vm1, %v237_v24, 0  ;;  %v337_v31 = vsel %vm33_vm1, %v335_v30, 0  ;;  %v530_v41 = vpack.c.bf16 %v661_v39, %v660_v38  ;;  %v531_v42 = vpack.c.bf16 %v662_v40, %v662_v40 }
   0x9   :  { %719 = vmatprep.subr.bf16.mxu0 %v785_v0  ;;  %v435_v37 = vsel %vm33_vm1, %v433_v36, 0 }
   0xa   :  { %v533_v43 = vsel %vm33_vm1, %v531_v42, 0 }
   0xb   :  { %702 = vmatmul.mubr.msk.bf16.vlgmr.msra.gmra.mrb[0].mxu0 %vm29_vm2, %v827_v7 }
   0xc   :  { %721 = vmatprep.mubr.msk.bf16.mxu0 %vm786_vm0, %v785_v0  ;;  %720 = vmatpush3.bf16.msra.mxu0 %v837_v8 }
   0xd   :  { %733 = vmatprep.subr.bf16.mxu0 %v785_v0 }
  0xde   :  { %v71_v11 = vpop.f32.mrb[0].mxu0 }
  0xdf   :  { %v703_v13 = vpop.f32.mrb[1].mxu0 }
  0xe0   :  { %v74_v14 = vpop.f32.mrb[2].mxu0 }
  0xe1   :  { %v78_v16 = vpack.c.bf16 %v74_v14, %v71_v11  ;;  %v704_v17 = vpop.f32.mrb[3].mxu0 }
  0xe3   :  { %708 = vmatmul.mubr.msk.bf16.vlgmr.msra.gmra.mrb[0].mxu1 %vm85_vm3, %v78_v16 }
  0xe4   :  { %712 = vmatpush3.bf16.msra.mxu1 %v138_v15  ;;  %715 = vmatprep.mubr.msk.bf16.mxu1 %vm786_vm0, %v785_v0 }
  0xe5   :  { %713 = vmatprep.subr.bf16.mxu1 %v785_v0 }
  0xe8   :  { %714 = vmatpush3.bf16.msra.mxu1 %v141_v19 }
  0xe9   :  { %725 = vmatprep.subr.bf16.mxu1 %v785_v0 }
  0xeb   :  { %716 = vmatmul.mubr.msk.bf16.vlgmr.msra.gmra.mrb[4].mxu1 %vm29_vm2, %v827_v7 }
  0xec   :  { %726 = vmatpush3.bf16.msra.mxu1 %v236_v23  ;;  %729 = vmatprep.mubr.msk.bf16.mxu1 %vm786_vm0, %v785_v0 }
  0xed   :  { %727 = vmatprep.subr.bf16.mxu1 %v785_v0 }
  0xf0   :  { %728 = vmatpush3.bf16.msra.mxu1 %v239_v25 }
  0xf1   :  { %739 = vmatprep.subr.bf16.mxu1 %v785_v0 }
  0xf3   :  { %730 = vmatmul.mubr.msk.bf16.vlgmr.msra.gmra.mrb[8].mxu1 %vm29_vm2, %v827_v7 }
  0xf4   :  { %740 = vmatpush3.bf16.msra.mxu1 %v334_v29  ;;  %743 = vmatprep.mubr.msk.bf16.mxu1 %vm786_vm0, %v785_v0 }
  0xf5   :  { %741 = vmatprep.subr.bf16.mxu1 %v785_v0 }
  0xf8   :  { %742 = vmatpush3.bf16.msra.mxu1 %v337_v31 }
  0xf9   :  { %753 = vmatprep.subr.bf16.mxu1 %v785_v0 }
  0xfb   :  { %744 = vmatmul.mubr.msk.bf16.vlgmr.msra.gmra.mrb[12].mxu1 %vm29_vm2, %v827_v7 }
  0xfc   :  { %754 = vmatpush3.bf16.msra.mxu1 %v432_v35  ;;  %757 = vmatprep.mubr.msk.bf16.mxu1 %vm786_vm0, %v785_v0 }
  0xfd   :  { %755 = vmatprep.subr.bf16.mxu1 %v785_v0 }
 0x100   :  { %756 = vmatpush3.bf16.msra.mxu1 %v435_v37 }
 0x101   :  { %767 = vmatprep.subr.bf16.mxu1 %v785_v0 }
 0x103   :  { %758 = vmatmul.mubr.msk.bf16.vlgmr.msra.gmra.mrb[16].mxu1 %vm29_vm2, %v827_v7 }
 0x104   :  { %768 = vmatpush3.bf16.msra.mxu1 %v530_v41  ;;  %771 = vmatprep.mubr.msk.bf16.mxu1 %vm786_vm0, %v785_v0 }
 0x105   :  { %769 = vmatprep.subr.bf16.mxu1 %v785_v0 }
 0x108   :  { %770 = vmatpush3.bf16.msra.mxu1 %v533_v43 }
 0x10b   :  { %772 = vmatmul.mubr.msk.bf16.vlgmr.msra.gmra.mrb[20].mxu1 %vm29_vm2, %v827_v7 }
 0x1b6   :  { %v123_v44 = vpop.f32.mrb[0].mxu1 }
 0x1b7   :  { %131 = vst.msk [vmem:[%s994_s3] sm:$0xff] %vm130_vm4, %v123_v44  ;;  %v709_v45 = vpop.f32.mrb[1].mxu1 }
 0x1b8   :  { %v126_v46 = vpop.f32.mrb[2].mxu1 }
 0x1b9   :  { %133 = vst.msk [vmem:[%s994_s3 + $0x8] sm:$0x1] %vm132_vm5, %v126_v46  ;;  %v710_v47 = vpop.f32.mrb[3].mxu1 }
 0x1be   :  { %v177_v48 = vpop.f32.mrb[4].mxu1 }
 0x1bf   :  { %v717_v49 = vpop.f32.mrb[5].mxu1 }
 0x1c0   :  { %v180_v50 = vpop.f32.mrb[6].mxu1 }
 0x1c1   :  { %v184_v51 = vpack.c.bf16 %v180_v50, %v177_v48  ;;  %v718_v52 = vpop.f32.mrb[7].mxu1 }
 0x1c3   :  { %722 = vmatmul.mubr.msk.bf16.vlgmr.msra.gmra.mrb[4].mxu0 %vm85_vm3, %v184_v51 }
 0x1c4   :  { %734 = vmatpush3.bf16.msra.mxu0 %v837_v8  ;;  %735 = vmatprep.mubr.msk.bf16.mxu0 %vm786_vm0, %v785_v0 }
 0x1c5   :  { %747 = vmatprep.subr.bf16.mxu0 %v785_v0 }
 0x1c6   :  { %v275_v53 = vpop.f32.mrb[8].mxu1 }
 0x1c7   :  { %v731_v54 = vpop.f32.mrb[9].mxu1 }
 0x1c8   :  { %v278_v55 = vpop.f32.mrb[10].mxu1 }
 0x1c9   :  { %v282_v56 = vpack.c.bf16 %v278_v55, %v275_v53  ;;  %v732_v57 = vpop.f32.mrb[11].mxu1 }
 0x1cb   :  { %736 = vmatmul.mubr.msk.bf16.vlgmr.msra.gmra.mrb[8].mxu0 %vm85_vm3, %v282_v56 }
 0x1cc   :  { %748 = vmatpush3.bf16.msra.mxu0 %v837_v8  ;;  %749 = vmatprep.mubr.msk.bf16.mxu0 %vm786_vm0, %v785_v0 }
 0x1cd   :  { %761 = vmatprep.subr.bf16.mxu0 %v785_v0 }
 0x1ce   :  { %v373_v58 = vpop.f32.mrb[12].mxu1 }
 0x1cf   :  { %v745_v59 = vpop.f32.mrb[13].mxu1 }
 0x1d0   :  { %v376_v60 = vpop.f32.mrb[14].mxu1 }
 0x1d1   :  { %v380_v61 = vpack.c.bf16 %v376_v60, %v373_v58  ;;  %v746_v62 = vpop.f32.mrb[15].mxu1 }
 0x1d3   :  { %750 = vmatmul.mubr.msk.bf16.vlgmr.msra.gmra.mrb[12].mxu0 %vm85_vm3, %v380_v61 }
 0x1d4   :  { %762 = vmatpush3.bf16.msra.mxu0 %v837_v8  ;;  %763 = vmatprep.mubr.msk.bf16.mxu0 %vm786_vm0, %v785_v0 }
 0x1d5   :  { %775 = vmatprep.subr.bf16.mxu0 %v785_v0 }
 0x1d6   :  { %v471_v63 = vpop.f32.mrb[16].mxu1 }
 0x1d7   :  { %v759_v1 = vpop.f32.mrb[17].mxu1 }
 0x1d8   :  { %v474_v2 = vpop.f32.mrb[18].mxu1 }
 0x1d9   :  { %v478_v3 = vpack.c.bf16 %v474_v2, %v471_v63  ;;  %v760_v4 = vpop.f32.mrb[19].mxu1 }
 0x1db   :  { %764 = vmatmul.mubr.msk.bf16.vlgmr.msra.gmra.mrb[16].mxu0 %vm85_vm3, %v478_v3 }
 0x1dc   :  { %776 = vmatpush3.bf16.msra.mxu0 %v837_v8  ;;  %777 = vmatprep.mubr.msk.bf16.mxu0 %vm786_vm0, %v785_v0 }
 0x1de   :  { %v569_v5 = vpop.f32.mrb[20].mxu1 }
 0x1df   :  { %v773_v6 = vpop.f32.mrb[21].mxu1 }
 0x1e0   :  { %v572_v7 = vpop.f32.mrb[22].mxu1 }
 0x1e1   :  { %v576_v9 = vpack.c.bf16 %v572_v7, %v569_v5  ;;  %v774_v10 = vpop.f32.mrb[23].mxu1 }
 0x1e3   :  { %778 = vmatmul.mubr.msk.bf16.vlgmr.msra.gmra.mrb[20].mxu0 %vm85_vm3, %v576_v9 }
 0x296   :  { %v222_v11 = vpop.f32.mrb[4].mxu0 }
 0x297   :  { %637 = vst.msk [vmem:[%s994_s3 + $0x10] sm:$0xff] %vm130_vm4, %v222_v11  ;;  %v723_v12 = vpop.f32.mrb[5].mxu0 }
 0x298   :  { %v225_v13 = vpop.f32.mrb[6].mxu0 }
 0x299   :  { %638 = vst.msk [vmem:[%s994_s3 + $0x18] sm:$0x1] %vm132_vm5, %v225_v13  ;;  %v724_v0 = vpop.f32.mrb[7].mxu0 }
 0x29e   :  { %v320_v8 = vpop.f32.mrb[8].mxu0 }
 0x29f   :  { %644 = vst.msk [vmem:[%s994_s3 + $0x20] sm:$0xff] %vm130_vm4, %v320_v8  ;;  %v737_v14 = vpop.f32.mrb[9].mxu0 }
 0x2a0   :  { %v323_v15 = vpop.f32.mrb[10].mxu0 }
 0x2a1   :  { %645 = vst.msk [vmem:[%s994_s3 + $0x28] sm:$0x1] %vm132_vm5, %v323_v15  ;;  %v738_v16 = vpop.f32.mrb[11].mxu0 }
 0x2a6   :  { %v418_v17 = vpop.f32.mrb[12].mxu0 }
 0x2a7   :  { %651 = vst.msk [vmem:[%s994_s3 + $0x30] sm:$0xff] %vm130_vm4, %v418_v17  ;;  %v751_v18 = vpop.f32.mrb[13].mxu0 }
 0x2a8   :  { %v421_v19 = vpop.f32.mrb[14].mxu0 }
 0x2a9   :  { %652 = vst.msk [vmem:[%s994_s3 + $0x38] sm:$0x1] %vm132_vm5, %v421_v19  ;;  %v752_v20 = vpop.f32.mrb[15].mxu0 }
 0x2ae   :  { %v516_v21 = vpop.f32.mrb[16].mxu0 }
 0x2af   :  { %658 = vst.msk [vmem:[%s994_s3 + $0x40] sm:$0xff] %vm130_vm4, %v516_v21  ;;  %v765_v22 = vpop.f32.mrb[17].mxu0 }
 0x2b0   :  { %v519_v23 = vpop.f32.mrb[18].mxu0 }
 0x2b1   :  { %659 = vst.msk [vmem:[%s994_s3 + $0x48] sm:$0x1] %vm132_vm5, %v519_v23  ;;  %v766_v24 = vpop.f32.mrb[19].mxu0 }
 0x2b6   :  { %v614_v25 = vpop.f32.mrb[20].mxu0 }
 0x2b7   :  { %665 = vst.msk [vmem:[%s994_s3 + $0x50] sm:$0xff] %vm130_vm4, %v614_v25  ;;  %v779_v26 = vpop.f32.mrb[21].mxu0 }
 0x2b8   :  { %v617_v27 = vpop.f32.mrb[22].mxu0 }
 0x2b9   :  { %666 = vst.msk [vmem:[%s994_s3 + $0x58] sm:$0x1] %vm132_vm5, %v617_v27  ;;  %v780_v28 = vpop.f32.mrb[23].mxu0 }

</bundles_post_ra>
